<compile_context>
chip_gen: v5e
topology: v5e:2x2
jax: 0.10.0
libtpu: 0.0.40
codegen_flags: <defaults>
</compile_context>

<pallas_src>
import jax
import jax.numpy as jnp
from jax.experimental import pallas as pl
from jax.experimental.pallas import tpu as pltpu


def blackbox_kernel(w_ref, b_ref, x_ref, o_ref):
    # w: (D, 1)  VMEM, resident across all batch tiles (same block each step)
    # b: (1, 1)  SMEM scalar (fused bias)
    # x: (tb, D) VMEM tile of the input in its natural (B, D) layout
    # o: (tb, 1) VMEM output tile
    y = jnp.dot(x_ref[...], w_ref[...], preferred_element_type=jnp.float32)
    y = y + b_ref[0, 0]
    o_ref[...] = jax.nn.sigmoid(y).astype(o_ref.dtype)


def _round_up(v, m):
    return ((v + m - 1) // m) * m


def blackbox_forward(x, w1, b1, w2, b2, *, block_b=65536):
    """x: (B, D). w1: (D, 10). b1: (10,). w2: (10, 1). b2: (1,). Returns (B, 1)."""
    B, D = x.shape

    # --- Algebraic fusion of the two Linear layers (plain XLA, tiny) ---------
    #   y = (x @ w1 + b1) @ w2 + b2 = x @ (w1 @ w2) + (b1 @ w2 + b2)
    w_eff = (w1 @ w2).astype(jnp.float32)                      # (D, 1)
    b_eff = (b1 @ w2 + b2).reshape(1, 1).astype(jnp.float32)   # (1, 1)

    # --- Batch tiling on the sublane axis (natural (B, D) layout) ------------
    # tb: multiple of 8 sublanes; capped at block_b (8 MiB f32 tile at D=32,
    # i.e. 16 MiB double-buffered -> fits v5e/v6e/v7x VMEM); split into >= 2
    # grid steps when possible so v7x's two TensorCores both get work.
    tb_full = _round_up(B, 8)
    if tb_full <= block_b:
        tb = _round_up(pl.cdiv(B, 2), 8) if B >= 16 else tb_full
    else:
        tb = block_b
    grid_b = pl.cdiv(B, tb)  # last block may be partial; Pallas masks OOB rows

    out = pl.pallas_call(
        blackbox_kernel,
        out_shape=jax.ShapeDtypeStruct((B, 1), x.dtype),
        grid_spec=pltpu.PrefetchScalarGridSpec(
            num_scalar_prefetch=0,
            grid=(grid_b,),
            in_specs=[
                # Fused weight column: same block every step -> VMEM-resident.
                pl.BlockSpec((D, 1), lambda i: (0, 0)),
                # Scalar fused bias in SMEM (no padded VMEM tile / extra DMA).
                pl.BlockSpec(memory_space=pltpu.MemorySpace.SMEM),
                # Input tiled along the batch (sublane) axis, no transpose/pad.
                pl.BlockSpec((tb, D), lambda i: (i, 0)),
            ],
            out_specs=pl.BlockSpec((tb, 1), lambda i: (i, 0)),
        ),
        compiler_params=pltpu.CompilerParams(
            # Batch tiles are independent -> shard across TCs on v7x.
            dimension_semantics=("parallel",),
            # Above scoped defaults, below v7x's 64 MiB physical VMEM.
            vmem_limit_bytes=48 * 1024 * 1024,
        ),
        cost_estimate=pl.CostEstimate(
            flops=2 * B * D,
            transcendentals=B,
            bytes_accessed=B * D * 4 + B * 4 + D * 4 + 4,
        ),
    )(w_eff, b_eff, x)

    return out


def reference_forward(x, w1, b1, w2, b2):
    h = x @ w1 + b1
    y = h @ w2 + b2
    return jax.nn.sigmoid(y)


if __name__ == "__main__":
    key = jax.random.PRNGKey(0)
    D = 32   # inp_shape
    H1 = 10  # hidden_dim_1 from the module

    k1, kb1, k2, kb2, kx1, kx2 = jax.random.split(key, 6)
    # Deterministic parameter init (PyTorch-like uniform bounds, synthetic).
    w1 = jax.random.uniform(k1, (D, H1), minval=-1.0 / jnp.sqrt(D),
                            maxval=1.0 / jnp.sqrt(D), dtype=jnp.float32)
    b1 = jax.random.uniform(kb1, (H1,), minval=-1.0 / jnp.sqrt(D),
                            maxval=1.0 / jnp.sqrt(D), dtype=jnp.float32)
    w2 = jax.random.uniform(k2, (H1, 1), minval=-1.0 / jnp.sqrt(H1),
                            maxval=1.0 / jnp.sqrt(H1), dtype=jnp.float32)
    b2 = jax.random.uniform(kb2, (1,), minval=-1.0 / jnp.sqrt(H1),
                            maxval=1.0 / jnp.sqrt(H1), dtype=jnp.float32)

    # Case 1: tiny batch (single grid step, tb == round_up(B, 8)).
    B = 8
    x = jax.random.normal(kx1, (B, D), dtype=jnp.float32)
    out = blackbox_forward(x, w1, b1, w2, b2)
    jax.block_until_ready(out)
    ref = reference_forward(x, w1, b1, w2, b2)
    assert out.shape == (B, 1)
    assert jnp.allclose(out, ref, atol=1e-5, rtol=1e-5)

    # Case 2: non-aligned batch, multiple grid steps + partial last block.
    B2 = 300
    x2 = jax.random.normal(kx2, (B2, D), dtype=jnp.float32)
    out2 = blackbox_forward(x2, w1, b1, w2, b2, block_b=128)
    jax.block_until_ready(out2)
    ref2 = reference_forward(x2, w1, b1, w2, b2)
    assert out2.shape == (B2, 1)
    assert jnp.allclose(out2, ref2, atol=1e-5, rtol=1e-5)

    print("KERNEL_OK")
</pallas_src>

<mosaic_0001>
module attributes {stable_mosaic.version = 11 : i64} {
  func.func @blackbox_kernel(%arg0: i32, %arg1: memref<32x1xf32, #tpu.memory_space<vmem>>, %arg2: memref<1x1xf32, #tpu.memory_space<smem>>, %arg3: memref<8x32xf32, #tpu.memory_space<vmem>>, %arg4: memref<8x1xf32, #tpu.memory_space<vmem>>) attributes {dimension_semantics = [#tpu.dimension_semantics<parallel>], iteration_bounds = array<i64: 1>, scalar_prefetch = 0 : i64, scratch_operands = 0 : i64, tpu.core_type = #tpu.core_type<tc>, window_params = [{pipeline_mode = #tpu.pipeline_mode<synchronous>, transform_indices = @transform_0, window_bounds = array<i64: 32, 1>}, {transform_indices = @transform_1, window_bounds = array<i64: 1, 1>}, {transform_indices = @transform_2, window_bounds = array<i64: 8, 32>}, {transform_indices = @transform_3, window_bounds = array<i64: 8, 1>}]} {
    %c0 = arith.constant 0 : index
    %c0_0 = arith.constant 0 : index
    %0 = vector.load %arg3[%c0, %c0_0] : memref<8x32xf32, #tpu.memory_space<vmem>>, vector<8x32xf32>
    %c0_1 = arith.constant 0 : index
    %c0_2 = arith.constant 0 : index
    %1 = vector.load %arg1[%c0_1, %c0_2] : memref<32x1xf32, #tpu.memory_space<vmem>>, vector<32x1xf32>
    %cst = arith.constant dense<0.000000e+00> : vector<8x1xf32>
    %2 = tpu.matmul %0, %1, %cst {dimension_numbers = #tpu.dot_dimension_numbers<[1], [0], [0], [1], [0, 0, 1, 1], [], []>} : vector<8x32xf32>, vector<32x1xf32>, vector<8x1xf32> -> vector<8x1xf32>
    %c0_3 = arith.constant 0 : index
    %c0_4 = arith.constant 0 : index
    %3 = memref.load %arg2[%c0_3, %c0_4] : memref<1x1xf32, #tpu.memory_space<smem>>
    %4 = vector.broadcast %3 : f32 to vector<8x1xf32>
    %5 = arith.addf %2, %4 : vector<8x1xf32>
    %6 = arith.negf %5 : vector<8x1xf32>
    %7 = math.exp %6 : vector<8x1xf32>
    %cst_5 = arith.constant 1.000000e+00 : f32
    %8 = vector.broadcast %cst_5 : f32 to vector<8x1xf32>
    %9 = arith.addf %8, %7 : vector<8x1xf32>
    %10 = arith.divf %8, %9 : vector<8x1xf32>
    %c0_6 = arith.constant 0 : index
    %c0_7 = arith.constant 0 : index
    %11 = vector.load %arg4[%c0_6, %c0_7] : memref<8x1xf32, #tpu.memory_space<vmem>>, vector<8x1xf32>
    tpu.vector_store %arg4[%c0_6, %c0_7], %10 {strides = array<i32>} : memref<8x1xf32, #tpu.memory_space<vmem>>, vector<8x1xf32>,
    return
  }
  func.func @transform_0(%arg0: i32) -> (i32, i32) {
    %c0_i32 = arith.constant 0 : i32
    %c0_i32_0 = arith.constant 0 : i32
    %c0_i32_1 = arith.constant 0 : i32
    return %c0_i32, %c0_i32_0 : i32, i32
  }
  func.func @transform_1(%arg0: i32) -> (i32, i32) {
    %c0_i32 = arith.constant 0 : i32
    %c0_i32_0 = arith.constant 0 : i32
    %c0_i32_1 = arith.constant 0 : i32
    return %c0_i32, %c0_i32_0 : i32, i32
  }
  func.func @transform_2(%arg0: i32) -> (i32, i32) {
    %c0_i32 = arith.constant 0 : i32
    %c0_i32_0 = arith.constant 0 : i32
    return %arg0, %c0_i32 : i32, i32
  }
  func.func @transform_3(%arg0: i32) -> (i32, i32) {
    %c0_i32 = arith.constant 0 : i32
    %c0_i32_0 = arith.constant 0 : i32
    return %arg0, %c0_i32 : i32, i32
  }
}

</mosaic_0001>

<bundles_post_ra>
// kernel: tpu_custom_call.1
= control target key start
LH: loop header
LB: loop body
LE: loop exit
PB: predicated region body
PF: predicated region fallthrough
CT: control target
= control target key end

     0   :  { %vm22_vm0 = vcmask 261120   ;;  %vm65_vm4 = vcmask 7168   ;;  %s118_s0 = inlined_call_operand.vmem [shape: f32[32,1], index: 0, kind: input, shape index: {}]   ;;  %s119_s2 = inlined_call_operand.vmem [shape: f32[8,32], index: 2, kind: input, shape index: {}]   ;;  %s120_s1 = inlined_call_operand.<no memory space> [shape: f32[1,1], index: 1, kind: input, shape index: {}]   ;;  %s121_s3 = inlined_call_operand.vmem [shape: f32[8,1], index: 3, kind: output, shape index: {}]  }
   0x1   :  { %v19_v0 = vld [vmem:[%s118_s0 + $0x18] sm:$0xff]  ;;  %v18_v1 = vld [vmem:[%s118_s0 + $0x10] sm:$0xff]  ;;  %v17_v2 = vld [vmem:[%s118_s0 + $0x8] sm:$0xff]  ;;  %v21_v5 = vstv %s120_s1 }
   0x2   :  { %38 = vmatpush.msra.mxu0 %v19_v0  ;;  %v16_v3 = vld [vmem:[%s118_s0] sm:$0xff] }
   0x3   :  { %v15_v4 = vld [vmem:[%s119_s2] sm:$0xff] }
   0x4   :  { %39 = vmatpush.msra.mxu0 %v18_v1 }
   0x6   :  { %40 = vmatpush.msra.mxu0 %v17_v2 }
   0x8   :  { %41 = vmatpush.msra.mxu0 %v16_v3 }
   0x9   :  { %71 = vmatmul.msk.f32.vlgmr.msra.gmra.mxu0 %vm22_vm0, %v15_v4 }
  0x86   :  { %v43_v6 = vpop.f32.mrf.mxu0 }
  0x87   :  { %v44_v7 = vadd.f32 %v43_v6, %v21_v5 }
  0x89   :  { %v72_v8 = vmul.f32 -1.442695, %v44_v7 }
  0x8b   :  { %73 = vpow2.f32 %v72_v8 }
  0x91   :  { %v74_v9 = vpop.eup %73 }
  0x92   :  { %v49_v10 = vadd.f32 1.0, %v74_v9 }
  0x94   :  { %75 = vrcp.f32 %v49_v10  ;;  %v61_v14 = vand.u32 2147483648, %v49_v10  ;;  %v59_v16 = vand.u32 2147483647, %v49_v10  ;;  %vm55_vm2 = vweird.f32 %v49_v10 }
  0x96   :  { %v62_v18 = vor.u32 1.1754944e-38, %v61_v14  ;;  %vm60_vm5 = vcmp.eq.f32.partialorder %v59_v16, 8.507059e+37 }
  0x9a   :  { %v76_v11 = vpop.eup %75 }
  0x9b   :  { %v51_v12 = vmul.f32 %v76_v11, %v49_v10  ;;  %vm56_vm1 = vweird.f32 %v76_v11 }
  0x9c   :  { %vm57_vm3 = vmor %vm55_vm2, %vm56_vm1 }
  0x9d   :  { %v52_v13 = vsub.f32 1.0, %v51_v12 }
  0x9f   :  { %v53_v15 = vmul.f32 %v76_v11, %v52_v13 }
  0xa1   :  { %v54_v17 = vadd.f32 %v76_v11, %v53_v15 }
  0xa3   :  { %v58_v19 = vsel %vm57_vm3, %v76_v11, %v54_v17 }
  0xa4   :  { %v63_v20 = vsel %vm60_vm5, %v62_v18, %v58_v19 }
  0xa5   :  { %66 = vst.msk [vmem:[%s121_s3] sm:$0xff] %vm65_vm4, %v63_v20 }

</bundles_post_ra>
